<compile_context>
chip_gen: v6e
topology: v6e:2x2x1
jax: 0.10.0
libtpu: 0.0.40
codegen_flags: <defaults>
</compile_context>

<pallas_src>
import math

import jax
import jax.numpy as jnp
from jax.experimental import pallas as pl
from jax.experimental.pallas import tpu as pltpu


def _fte_kernel(x_ref, vec_ref, wv1_ref, wv2_ref, w1x_ref, w1s_ref, b1_ref,
                w2a_ref, w2b_ref, b2a_ref, b2b_ref, dx_ref, dvec_ref):
    tm, H = x_ref.shape
    inv_sqrt_h = 1.0 / math.sqrt(H)
    inv_sqrt_2 = 1.0 / math.sqrt(2.0)
    cdt = jnp.bfloat16

    # ---- vec_proj: per-component (tm,H)@(H,H) matmuls, v1/v2 directly ------
    vec_f = vec_ref[...]                       # (tm, 3H) f32, cast in-kernel
    wv1 = wv1_ref[...]
    wv2 = wv2_ref[...]
    v1 = []
    v2 = []
    for c in range(3):
        vc = vec_f[:, c * H:(c + 1) * H].astype(cdt)
        v1.append(jnp.dot(vc, wv1, preferred_element_type=jnp.float32))
        v2.append(jnp.dot(vc, wv2, preferred_element_type=jnp.float32))

    # Reductions over the 3 spatial components (plain VPU adds).
    sum_sq = v1[0] * v1[0] + v1[1] * v1[1] + v1[2] * v1[2]
    dot = v1[0] * v2[0] + v1[1] * v2[1] + v1[2] * v2[2]
    scalar = jnp.sqrt(sum_sq + 1e-10)          # (tm, H) f32
    vec_dot = dot * inv_sqrt_h                 # (tm, H) f32

    # ---- xvec_proj MLP: Linear(2H->H) + SiLU + Linear(H->3H) ---------------
    # cat([x, scalar]) @ w1  ==  x @ w1x + scalar @ w1s      (no concat copy)
    h1 = (jnp.dot(x_ref[...].astype(cdt), w1x_ref[...],
                  preferred_element_type=jnp.float32)
          + jnp.dot(scalar.astype(cdt), w1s_ref[...],
                    preferred_element_type=jnp.float32)
          + b1_ref[...])
    h1 = h1 * jax.nn.sigmoid(h1)               # SiLU in f32
    h1c = h1.astype(cdt)

    # w2a = w2[:, :H] + w2[:, H:2H]  -> gives (xvec1 + xvec2) directly
    xv12 = jnp.dot(h1c, w2a_ref[...], preferred_element_type=jnp.float32) \
        + b2a_ref[...]
    xv3 = jnp.dot(h1c, w2b_ref[...], preferred_element_type=jnp.float32) \
        + b2b_ref[...]

    dx_ref[...] = ((xv12 + vec_dot) * inv_sqrt_2).astype(dx_ref.dtype)

    # dvec[:, c, :] = xvec3 * vec2[:, c, :] in the flat (tm, 3H) layout.
    for c in range(3):
        dvec_ref[:, c * H:(c + 1) * H] = (xv3 * v2[c]).astype(dvec_ref.dtype)


def _round_up(a, b):
    return ((a + b - 1) // b) * b


def fte_forward(x, vec, wv, w1, b1, w2, b2, *, tm=512, out_dtype=None):
    """FTE forward.

    x   : (N, H) f32
    vec : (N, 3, H) f32
    wv  : (H, 2H)   vec_proj weight, stored (in, out)
    w1  : (2H, H)   xvec_proj[0] weight, stored (in, out)
    b1  : (1, H)
    w2  : (H, 3H)   xvec_proj[2] weight, stored (in, out)
    b2  : (1, 3H)
    Returns dx (N, H), dvec (N, 3, H) in out_dtype (default: x.dtype).
    """
    N, H = x.shape
    assert vec.shape == (N, 3, H)
    out_dtype = x.dtype if out_dtype is None else out_dtype
    cdt = jnp.bfloat16                              # MXU operand dtype

    # Free row-major reshape; NO transpose / NO external cast of x or vec.
    vec_flat = vec.reshape(N, 3 * H)

    # Small weight prep (one-time, tiny vs. the activation streams).
    wv1 = wv[:, :H].astype(cdt)
    wv2 = wv[:, H:].astype(cdt)
    w1x = w1[:H].astype(cdt)
    w1s = w1[H:].astype(cdt)
    w2a = (w2[:, :H] + w2[:, H:2 * H]).astype(cdt)  # pre-summed -> xv1+xv2
    w2b = w2[:, 2 * H:].astype(cdt)
    b1_c = b1.reshape(1, H).astype(jnp.float32)
    b2_r = b2.reshape(1, 3 * H).astype(jnp.float32)
    b2a = b2_r[:, :H] + b2_r[:, H:2 * H]
    b2b = b2_r[:, 2 * H:]

    # Node tile: multiple of 16 (bf16 sublane packing); prefer >=2 grid steps
    # so both TensorCores get work on v7x / megacore; pad N for the tail.
    if N > 16:
        tm_cap = _round_up(-(-N // 2), 16)          # ceil(N/2), 16-aligned
    else:
        tm_cap = 16
    tm_eff = max(16, min(_round_up(tm, 16), tm_cap))
    n_pad = _round_up(N, tm_eff)
    x_p = x if n_pad == N else jnp.pad(x, ((0, n_pad - N), (0, 0)))
    vec_p = vec_flat if n_pad == N else jnp.pad(vec_flat,
                                                ((0, n_pad - N), (0, 0)))
    grid = (n_pad // tm_eff,)

    out_bytes = jnp.dtype(out_dtype).itemsize
    # Roofline hints.
    flops = 2 * n_pad * 10 * H * H                  # 6 vec_proj + 2 w1 + 2 w2
    bytes_accessed = (n_pad * H * 4 + n_pad * 3 * H * 4          # x, vec in
                      + 6 * H * H * 2 + 3 * H * 4                # weights, biases
                      + n_pad * 4 * H * out_bytes)               # dx, dvec out
    cost = pl.CostEstimate(flops=flops, transcendentals=2 * n_pad * H,
                           bytes_accessed=bytes_accessed)

    # VMEM footprint: double-buffered I/O blocks + resident weights + f32
    # intermediates; cap at 64 MiB so the limit is valid on v7x too.
    blk_bytes = tm_eff * H * 4 + tm_eff * 3 * H * 4 \
        + tm_eff * H * out_bytes + tm_eff * 3 * H * out_bytes
    w_bytes = 6 * H * H * 2 + 3 * H * 4
    vmem_est = 2 * (blk_bytes + w_bytes) + 12 * tm_eff * H * 4 + (2 << 20)
    vmem_limit = int(min(max(vmem_est, 32 << 20), 64 << 20))

    dx, dvec_flat = pl.pallas_call(
        _fte_kernel,
        out_shape=(
            jax.ShapeDtypeStruct((n_pad, H), out_dtype),
            jax.ShapeDtypeStruct((n_pad, 3 * H), out_dtype),
        ),
        grid_spec=pltpu.PrefetchScalarGridSpec(
            num_scalar_prefetch=0,
            grid=grid,
            in_specs=[
                pl.BlockSpec((tm_eff, H), lambda i: (i, 0)),        # x
                pl.BlockSpec((tm_eff, 3 * H), lambda i: (i, 0)),    # vec (N,3H)
                pl.BlockSpec((H, H), lambda i: (0, 0)),             # wv1
                pl.BlockSpec((H, H), lambda i: (0, 0)),             # wv2
                pl.BlockSpec((H, H), lambda i: (0, 0)),             # w1x
                pl.BlockSpec((H, H), lambda i: (0, 0)),             # w1s
                pl.BlockSpec((1, H), lambda i: (0, 0)),             # b1
                pl.BlockSpec((H, H), lambda i: (0, 0)),             # w2a
                pl.BlockSpec((H, H), lambda i: (0, 0)),             # w2b
                pl.BlockSpec((1, H), lambda i: (0, 0)),             # b2a
                pl.BlockSpec((1, H), lambda i: (0, 0)),             # b2b
            ],
            out_specs=[
                pl.BlockSpec((tm_eff, H), lambda i: (i, 0)),        # dx
                pl.BlockSpec((tm_eff, 3 * H), lambda i: (i, 0)),    # dvec (N,3H)
            ],
        ),
        compiler_params=pltpu.CompilerParams(
            dimension_semantics=("parallel",),
            vmem_limit_bytes=vmem_limit),
        cost_estimate=cost,
    )(x_p, vec_p, wv1, wv2, w1x, w1s, b1_c, w2a, w2b, b2a, b2b)

    dx = dx[:N]
    dvec = dvec_flat[:N].reshape(N, 3, H)           # free reshape, no transpose
    return dx, dvec


def _xavier_uniform(key, fan_in, fan_out):
    # matches nn.init.xavier_uniform_ (gain=1); stored as (in, out)
    bound = math.sqrt(6.0 / (fan_in + fan_out))
    return jax.random.uniform(key, (fan_in, fan_out), jnp.float32,
                              minval=-bound, maxval=bound)


def _reference(x, vec, wv, w1, b1, w2, b2):
    """Pure-JAX reference mirroring the kernel's bf16-matmul / f32-accumulate."""
    N, _, H = vec.shape
    bf = jnp.bfloat16
    wv1 = wv[:, :H].astype(bf)
    wv2 = wv[:, H:].astype(bf)
    w1x = w1[:H].astype(bf)
    w1s = w1[H:].astype(bf)
    w2a = (w2[:, :H] + w2[:, H:2 * H]).astype(bf)
    w2b = w2[:, 2 * H:].astype(bf)
    b2a = b2[:, :H] + b2[:, H:2 * H]
    b2b = b2[:, 2 * H:]

    vflat = vec.reshape(N * 3, H).astype(bf)
    v1 = jnp.dot(vflat, wv1, preferred_element_type=jnp.float32).reshape(N, 3, H)
    v2 = jnp.dot(vflat, wv2, preferred_element_type=jnp.float32).reshape(N, 3, H)
    scalar = jnp.sqrt(jnp.sum(v1 * v1, axis=1) + 1e-10)
    vec_dot = jnp.sum(v1 * v2, axis=1) * (1.0 / math.sqrt(H))
    h1 = (jnp.dot(x.astype(bf), w1x, preferred_element_type=jnp.float32)
          + jnp.dot(scalar.astype(bf), w1s, preferred_element_type=jnp.float32)
          + b1)
    h1 = h1 * jax.nn.sigmoid(h1)
    h1b = h1.astype(bf)
    xv12 = jnp.dot(h1b, w2a, preferred_element_type=jnp.float32) + b2a
    xv3 = jnp.dot(h1b, w2b, preferred_element_type=jnp.float32) + b2b
    dx = (xv12 + vec_dot) * (1.0 / math.sqrt(2.0))
    dvec = xv3[:, None, :] * v2
    return dx, dvec


if __name__ == "__main__":
    # Small shapes: N=20 exercises multi-step grid + tail padding, H=32 hidden.
    # (node_frame from the PyTorch signature is unused by forward and omitted.)
    N, H = 20, 32
    key = jax.random.PRNGKey(0)
    kx, kv, k1, k2, k3, k4, k5 = jax.random.split(key, 7)

    x = jax.random.normal(kx, (N, H), jnp.float32)
    vec = jax.random.normal(kv, (N, 3, H), jnp.float32)

    wv = _xavier_uniform(k1, H, 2 * H)              # vec_proj (no bias)
    w1 = _xavier_uniform(k2, 2 * H, H)              # xvec_proj[0]
    w2 = _xavier_uniform(k3, H, 3 * H)              # xvec_proj[2]
    b1 = 0.1 * jax.random.normal(k4, (1, H), jnp.float32)
    b2 = 0.1 * jax.random.normal(k5, (1, 3 * H), jnp.float32)

    # Default tile (auto-clamped -> 2 grid steps, padded 20 -> 32), f32 out.
    dx, dvec = fte_forward(x, vec, wv, w1, b1, w2, b2)
    # Exact-fit single-step path (no padding).
    dx1, dvec1 = fte_forward(x[:16], vec[:16], wv, w1, b1, w2, b2)
    # bf16 output path (largest output stream halved).
    dx3, dvec3 = fte_forward(x, vec, wv, w1, b1, w2, b2, out_dtype=jnp.bfloat16)
    jax.block_until_ready((dx, dvec, dx1, dvec1, dx3, dvec3))

    dx_ref, dvec_ref = _reference(x, vec, wv, w1, b1, w2, b2)

    checks = (
        (dx, dvec, dx_ref, dvec_ref, 5e-3),
        (dx1, dvec1, dx_ref[:16], dvec_ref[:16], 5e-3),
        (dx3.astype(jnp.float32), dvec3.astype(jnp.float32),
         dx_ref, dvec_ref, 3e-2),
    )
    for got_dx, got_dvec, ref_dx, ref_dvec, tol in checks:
        assert jnp.allclose(got_dx, ref_dx, atol=tol, rtol=tol), \
            float(jnp.max(jnp.abs(got_dx - ref_dx)))
        assert jnp.allclose(got_dvec, ref_dvec, atol=tol, rtol=tol), \
            float(jnp.max(jnp.abs(got_dvec - ref_dvec)))

    print("KERNEL_OK")
</pallas_src>

<mosaic_0001>
module attributes {stable_mosaic.version = 11 : i64} {
  func.func @_fte_kernel(%arg0: i32, %arg1: memref<16x32xf32, #tpu.memory_space<vmem>>, %arg2: memref<16x96xf32, #tpu.memory_space<vmem>>, %arg3: memref<32x32xbf16, #tpu.memory_space<vmem>>, %arg4: memref<32x32xbf16, #tpu.memory_space<vmem>>, %arg5: memref<32x32xbf16, #tpu.memory_space<vmem>>, %arg6: memref<32x32xbf16, #tpu.memory_space<vmem>>, %arg7: memref<1x32xf32, #tpu.memory_space<vmem>>, %arg8: memref<32x32xbf16, #tpu.memory_space<vmem>>, %arg9: memref<32x32xbf16, #tpu.memory_space<vmem>>, %arg10: memref<1x32xf32, #tpu.memory_space<vmem>>, %arg11: memref<1x32xf32, #tpu.memory_space<vmem>>, %arg12: memref<16x32xf32, #tpu.memory_space<vmem>>, %arg13: memref<16x96xf32, #tpu.memory_space<vmem>>) attributes {dimension_semantics = [#tpu.dimension_semantics<parallel>], iteration_bounds = array<i64: 2>, scalar_prefetch = 0 : i64, scratch_operands = 0 : i64, tpu.core_type = #tpu.core_type<tc>, window_params = [{transform_indices = @transform_0, window_bounds = array<i64: 16, 32>}, {transform_indices = @transform_1, window_bounds = array<i64: 16, 96>}, {pipeline_mode = #tpu.pipeline_mode<synchronous>, transform_indices = @transform_2, window_bounds = array<i64: 32, 32>}, {pipeline_mode = #tpu.pipeline_mode<synchronous>, transform_indices = @transform_3, window_bounds = array<i64: 32, 32>}, {pipeline_mode = #tpu.pipeline_mode<synchronous>, transform_indices = @transform_4, window_bounds = array<i64: 32, 32>}, {pipeline_mode = #tpu.pipeline_mode<synchronous>, transform_indices = @transform_5, window_bounds = array<i64: 32, 32>}, {pipeline_mode = #tpu.pipeline_mode<synchronous>, transform_indices = @transform_6, window_bounds = array<i64: 1, 32>}, {pipeline_mode = #tpu.pipeline_mode<synchronous>, transform_indices = @transform_7, window_bounds = array<i64: 32, 32>}, {pipeline_mode = #tpu.pipeline_mode<synchronous>, transform_indices = @transform_8, window_bounds = array<i64: 32, 32>}, {pipeline_mode = #tpu.pipeline_mode<synchronous>, transform_indices = @transform_9, window_bounds = array<i64: 1, 32>}, {pipeline_mode = #tpu.pipeline_mode<synchronous>, transform_indices = @transform_10, window_bounds = array<i64: 1, 32>}, {transform_indices = @transform_11, window_bounds = array<i64: 16, 32>}, {transform_indices = @transform_12, window_bounds = array<i64: 16, 96>}]} {
    %c0 = arith.constant 0 : index
    %c0_0 = arith.constant 0 : index
    %0 = vector.load %arg2[%c0, %c0_0] : memref<16x96xf32, #tpu.memory_space<vmem>>, vector<16x96xf32>
    %c0_1 = arith.constant 0 : index
    %c0_2 = arith.constant 0 : index
    %1 = vector.load %arg3[%c0_1, %c0_2] : memref<32x32xbf16, #tpu.memory_space<vmem>>, vector<32x32xbf16>
    %c0_3 = arith.constant 0 : index
    %c0_4 = arith.constant 0 : index
    %2 = vector.load %arg4[%c0_3, %c0_4] : memref<32x32xbf16, #tpu.memory_space<vmem>>, vector<32x32xbf16>
    %3 = vector.extract_strided_slice %0 {offsets = [0, 0], sizes = [16, 32], strides = [1, 1]} : vector<16x96xf32> to vector<16x32xf32>
    %4 = arith.truncf %3 : vector<16x32xf32> to vector<16x32xbf16>
    %cst = arith.constant dense<0.000000e+00> : vector<16x32xf32>
    %5 = tpu.matmul %4, %1, %cst {dimension_numbers = #tpu.dot_dimension_numbers<[1], [0], [0], [1], [0, 0, 1, 1], [], []>} : vector<16x32xbf16>, vector<32x32xbf16>, vector<16x32xf32> -> vector<16x32xf32>
    %cst_5 = arith.constant dense<0.000000e+00> : vector<16x32xf32>
    %6 = tpu.matmul %4, %2, %cst_5 {dimension_numbers = #tpu.dot_dimension_numbers<[1], [0], [0], [1], [0, 0, 1, 1], [], []>} : vector<16x32xbf16>, vector<32x32xbf16>, vector<16x32xf32> -> vector<16x32xf32>
    %7 = vector.extract_strided_slice %0 {offsets = [0, 32], sizes = [16, 32], strides = [1, 1]} : vector<16x96xf32> to vector<16x32xf32>
    %8 = arith.truncf %7 : vector<16x32xf32> to vector<16x32xbf16>
    %cst_6 = arith.constant dense<0.000000e+00> : vector<16x32xf32>
    %9 = tpu.matmul %8, %1, %cst_6 {dimension_numbers = #tpu.dot_dimension_numbers<[1], [0], [0], [1], [0, 0, 1, 1], [], []>} : vector<16x32xbf16>, vector<32x32xbf16>, vector<16x32xf32> -> vector<16x32xf32>
    %cst_7 = arith.constant dense<0.000000e+00> : vector<16x32xf32>
    %10 = tpu.matmul %8, %2, %cst_7 {dimension_numbers = #tpu.dot_dimension_numbers<[1], [0], [0], [1], [0, 0, 1, 1], [], []>} : vector<16x32xbf16>, vector<32x32xbf16>, vector<16x32xf32> -> vector<16x32xf32>
    %11 = vector.extract_strided_slice %0 {offsets = [0, 64], sizes = [16, 32], strides = [1, 1]} : vector<16x96xf32> to vector<16x32xf32>
    %12 = arith.truncf %11 : vector<16x32xf32> to vector<16x32xbf16>
    %cst_8 = arith.constant dense<0.000000e+00> : vector<16x32xf32>
    %13 = tpu.matmul %12, %1, %cst_8 {dimension_numbers = #tpu.dot_dimension_numbers<[1], [0], [0], [1], [0, 0, 1, 1], [], []>} : vector<16x32xbf16>, vector<32x32xbf16>, vector<16x32xf32> -> vector<16x32xf32>
    %cst_9 = arith.constant dense<0.000000e+00> : vector<16x32xf32>
    %14 = tpu.matmul %12, %2, %cst_9 {dimension_numbers = #tpu.dot_dimension_numbers<[1], [0], [0], [1], [0, 0, 1, 1], [], []>} : vector<16x32xbf16>, vector<32x32xbf16>, vector<16x32xf32> -> vector<16x32xf32>
    %15 = arith.mulf %5, %5 : vector<16x32xf32>
    %16 = arith.mulf %9, %9 : vector<16x32xf32>
    %17 = arith.addf %15, %16 : vector<16x32xf32>
    %18 = arith.mulf %13, %13 : vector<16x32xf32>
    %19 = arith.addf %17, %18 : vector<16x32xf32>
    %20 = arith.mulf %5, %6 : vector<16x32xf32>
    %21 = arith.mulf %9, %10 : vector<16x32xf32>
    %22 = arith.addf %20, %21 : vector<16x32xf32>
    %23 = arith.mulf %13, %14 : vector<16x32xf32>
    %24 = arith.addf %22, %23 : vector<16x32xf32>
    %cst_10 = arith.constant 1.000000e-10 : f32
    %25 = vector.broadcast %cst_10 : f32 to vector<16x32xf32>
    %26 = arith.addf %19, %25 : vector<16x32xf32>
    %27 = math.sqrt %26 : vector<16x32xf32>
    %cst_11 = arith.constant 0.176776692 : f32
    %28 = vector.broadcast %cst_11 : f32 to vector<16x32xf32>
    %29 = arith.mulf %24, %28 : vector<16x32xf32>
    %c0_12 = arith.constant 0 : index
    %c0_13 = arith.constant 0 : index
    %30 = vector.load %arg1[%c0_12, %c0_13] : memref<16x32xf32, #tpu.memory_space<vmem>>, vector<16x32xf32>
    %31 = arith.truncf %30 : vector<16x32xf32> to vector<16x32xbf16>
    %c0_14 = arith.constant 0 : index
    %c0_15 = arith.constant 0 : index
    %32 = vector.load %arg5[%c0_14, %c0_15] : memref<32x32xbf16, #tpu.memory_space<vmem>>, vector<32x32xbf16>
    %cst_16 = arith.constant dense<0.000000e+00> : vector<16x32xf32>
    %33 = tpu.matmul %31, %32, %cst_16 {dimension_numbers = #tpu.dot_dimension_numbers<[1], [0], [0], [1], [0, 0, 1, 1], [], []>} : vector<16x32xbf16>, vector<32x32xbf16>, vector<16x32xf32> -> vector<16x32xf32>
    %34 = arith.truncf %27 : vector<16x32xf32> to vector<16x32xbf16>
    %c0_17 = arith.constant 0 : index
    %c0_18 = arith.constant 0 : index
    %35 = vector.load %arg6[%c0_17, %c0_18] : memref<32x32xbf16, #tpu.memory_space<vmem>>, vector<32x32xbf16>
    %cst_19 = arith.constant dense<0.000000e+00> : vector<16x32xf32>
    %36 = tpu.matmul %34, %35, %cst_19 {dimension_numbers = #tpu.dot_dimension_numbers<[1], [0], [0], [1], [0, 0, 1, 1], [], []>} : vector<16x32xbf16>, vector<32x32xbf16>, vector<16x32xf32> -> vector<16x32xf32>
    %37 = arith.addf %33, %36 : vector<16x32xf32>
    %c0_20 = arith.constant 0 : index
    %c0_21 = arith.constant 0 : index
    %38 = vector.load %arg7[%c0_20, %c0_21] : memref<1x32xf32, #tpu.memory_space<vmem>>, vector<1x32xf32>
    %39 = vector.broadcast %38 : vector<1x32xf32> to vector<16x32xf32>
    %40 = arith.addf %37, %39 : vector<16x32xf32>
    %41 = arith.negf %40 : vector<16x32xf32>
    %42 = math.exp %41 : vector<16x32xf32>
    %cst_22 = arith.constant 1.000000e+00 : f32
    %43 = vector.broadcast %cst_22 : f32 to vector<16x32xf32>
    %44 = arith.addf %43, %42 : vector<16x32xf32>
    %45 = arith.divf %43, %44 : vector<16x32xf32>
    %46 = arith.mulf %40, %45 : vector<16x32xf32>
    %47 = arith.truncf %46 : vector<16x32xf32> to vector<16x32xbf16>
    %c0_23 = arith.constant 0 : index
    %c0_24 = arith.constant 0 : index
    %48 = vector.load %arg8[%c0_23, %c0_24] : memref<32x32xbf16, #tpu.memory_space<vmem>>, vector<32x32xbf16>
    %cst_25 = arith.constant dense<0.000000e+00> : vector<16x32xf32>
    %49 = tpu.matmul %47, %48, %cst_25 {dimension_numbers = #tpu.dot_dimension_numbers<[1], [0], [0], [1], [0, 0, 1, 1], [], []>} : vector<16x32xbf16>, vector<32x32xbf16>, vector<16x32xf32> -> vector<16x32xf32>
    %c0_26 = arith.constant 0 : index
    %c0_27 = arith.constant 0 : index
    %50 = vector.load %arg10[%c0_26, %c0_27] : memref<1x32xf32, #tpu.memory_space<vmem>>, vector<1x32xf32>
    %51 = vector.broadcast %50 : vector<1x32xf32> to vector<16x32xf32>
    %52 = arith.addf %49, %51 : vector<16x32xf32>
    %c0_28 = arith.constant 0 : index
    %c0_29 = arith.constant 0 : index
    %53 = vector.load %arg9[%c0_28, %c0_29] : memref<32x32xbf16, #tpu.memory_space<vmem>>, vector<32x32xbf16>
    %cst_30 = arith.constant dense<0.000000e+00> : vector<16x32xf32>
    %54 = tpu.matmul %47, %53, %cst_30 {dimension_numbers = #tpu.dot_dimension_numbers<[1], [0], [0], [1], [0, 0, 1, 1], [], []>} : vector<16x32xbf16>, vector<32x32xbf16>, vector<16x32xf32> -> vector<16x32xf32>
    %c0_31 = arith.constant 0 : index
    %c0_32 = arith.constant 0 : index
    %55 = vector.load %arg11[%c0_31, %c0_32] : memref<1x32xf32, #tpu.memory_space<vmem>>, vector<1x32xf32>
    %56 = vector.broadcast %55 : vector<1x32xf32> to vector<16x32xf32>
    %57 = arith.addf %54, %56 : vector<16x32xf32>
    %58 = arith.addf %52, %29 : vector<16x32xf32>
    %cst_33 = arith.constant 0.707106769 : f32
    %59 = vector.broadcast %cst_33 : f32 to vector<16x32xf32>
    %60 = arith.mulf %58, %59 : vector<16x32xf32>
    %c0_34 = arith.constant 0 : index
    %c0_35 = arith.constant 0 : index
    %61 = vector.load %arg12[%c0_34, %c0_35] : memref<16x32xf32, #tpu.memory_space<vmem>>, vector<16x32xf32>
    tpu.vector_store %arg12[%c0_34, %c0_35], %60 {strides = array<i32>} : memref<16x32xf32, #tpu.memory_space<vmem>>, vector<16x32xf32>,
    %62 = arith.mulf %57, %6 : vector<16x32xf32>
    %c0_36 = arith.constant 0 : index
    %c0_37 = arith.constant 0 : index
    %63 = vector.load %arg13[%c0_36, %c0_37] : memref<16x96xf32, #tpu.memory_space<vmem>>, vector<16x32xf32>
    tpu.vector_store %arg13[%c0_36, %c0_37], %62 {strides = array<i32>} : memref<16x96xf32, #tpu.memory_space<vmem>>, vector<16x32xf32>,
    %64 = arith.mulf %57, %10 : vector<16x32xf32>
    %c0_38 = arith.constant 0 : index
    %c32 = arith.constant 32 : index
    %65 = vector.load %arg13[%c0_38, %c32] : memref<16x96xf32, #tpu.memory_space<vmem>>, vector<16x32xf32>
    tpu.vector_store %arg13[%c0_38, %c32], %64 {strides = array<i32>} : memref<16x96xf32, #tpu.memory_space<vmem>>, vector<16x32xf32>,
    %66 = arith.mulf %57, %14 : vector<16x32xf32>
    %c0_39 = arith.constant 0 : index
    %c64 = arith.constant 64 : index
    %67 = vector.load %arg13[%c0_39, %c64] : memref<16x96xf32, #tpu.memory_space<vmem>>, vector<16x32xf32>
    tpu.vector_store %arg13[%c0_39, %c64], %66 {strides = array<i32>} : memref<16x96xf32, #tpu.memory_space<vmem>>, vector<16x32xf32>,
    return
  }
  func.func @transform_0(%arg0: i32) -> (i32, i32) {
    %c0_i32 = arith.constant 0 : i32
    %c0_i32_0 = arith.constant 0 : i32
    return %arg0, %c0_i32 : i32, i32
  }
  func.func @transform_1(%arg0: i32) -> (i32, i32) {
    %c0_i32 = arith.constant 0 : i32
    %c0_i32_0 = arith.constant 0 : i32
    return %arg0, %c0_i32 : i32, i32
  }
  func.func @transform_2(%arg0: i32) -> (i32, i32) {
    %c0_i32 = arith.constant 0 : i32
    %c0_i32_0 = arith.constant 0 : i32
    %c0_i32_1 = arith.constant 0 : i32
    return %c0_i32, %c0_i32_0 : i32, i32
  }
  func.func @transform_3(%arg0: i32) -> (i32, i32) {
    %c0_i32 = arith.constant 0 : i32
    %c0_i32_0 = arith.constant 0 : i32
    %c0_i32_1 = arith.constant 0 : i32
    return %c0_i32, %c0_i32_0 : i32, i32
  }
  func.func @transform_4(%arg0: i32) -> (i32, i32) {
    %c0_i32 = arith.constant 0 : i32
    %c0_i32_0 = arith.constant 0 : i32
    %c0_i32_1 = arith.constant 0 : i32
    return %c0_i32, %c0_i32_0 : i32, i32
  }
  func.func @transform_5(%arg0: i32) -> (i32, i32) {
    %c0_i32 = arith.constant 0 : i32
    %c0_i32_0 = arith.constant 0 : i32
    %c0_i32_1 = arith.constant 0 : i32
    return %c0_i32, %c0_i32_0 : i32, i32
  }
  func.func @transform_6(%arg0: i32) -> (i32, i32) {
    %c0_i32 = arith.constant 0 : i32
    %c0_i32_0 = arith.constant 0 : i32
    %c0_i32_1 = arith.constant 0 : i32
    return %c0_i32, %c0_i32_0 : i32, i32
  }
  func.func @transform_7(%arg0: i32) -> (i32, i32) {
    %c0_i32 = arith.constant 0 : i32
    %c0_i32_0 = arith.constant 0 : i32
    %c0_i32_1 = arith.constant 0 : i32
    return %c0_i32, %c0_i32_0 : i32, i32
  }
  func.func @transform_8(%arg0: i32) -> (i32, i32) {
    %c0_i32 = arith.constant 0 : i32
    %c0_i32_0 = arith.constant 0 : i32
    %c0_i32_1 = arith.constant 0 : i32
    return %c0_i32, %c0_i32_0 : i32, i32
  }
  func.func @transform_9(%arg0: i32) -> (i32, i32) {
    %c0_i32 = arith.constant 0 : i32
    %c0_i32_0 = arith.constant 0 : i32
    %c0_i32_1 = arith.constant 0 : i32
    return %c0_i32, %c0_i32_0 : i32, i32
  }
  func.func @transform_10(%arg0: i32) -> (i32, i32) {
    %c0_i32 = arith.constant 0 : i32
    %c0_i32_0 = arith.constant 0 : i32
    %c0_i32_1 = arith.constant 0 : i32
    return %c0_i32, %c0_i32_0 : i32, i32
  }
  func.func @transform_11(%arg0: i32) -> (i32, i32) {
    %c0_i32 = arith.constant 0 : i32
    %c0_i32_0 = arith.constant 0 : i32
    return %arg0, %c0_i32 : i32, i32
  }
  func.func @transform_12(%arg0: i32) -> (i32, i32) {
    %c0_i32 = arith.constant 0 : i32
    %c0_i32_0 = arith.constant 0 : i32
    return %arg0, %c0_i32 : i32, i32
  }
}

</mosaic_0001>

<bundles_post_ra>
// kernel: tpu_custom_call.1
= control target key start
LH: loop header
LB: loop body
LE: loop exit
PB: predicated region body
PF: predicated region fallthrough
CT: control target
= control target key end

     0   :  { %s2659_s0 = inlined_call_operand.hbm [shape: f32[32,32], index: 0, kind: input, shape index: {}]   ;;  %s2660_s1 = inlined_call_operand.hbm [shape: f32[32,96], index: 1, kind: input, shape index: {}]   ;;  %s2661_s2 = inlined_call_operand.hbm [shape: bf16[32,32], index: 2, kind: input, shape index: {}]   ;;  %s2662_s3 = inlined_call_operand.hbm [shape: bf16[32,32], index: 3, kind: input, shape index: {}]   ;;  %s2663_s4 = inlined_call_operand.hbm [shape: bf16[32,32], index: 4, kind: input, shape index: {}]   ;;  %s2664_s5 = inlined_call_operand.hbm [shape: bf16[32,32], index: 5, kind: input, shape index: {}]   ;;  %s2665_s6 = inlined_call_operand.vmem [shape: f32[1,32], index: 6, kind: input, shape index: {}]   ;;  %s2666_s7 = inlined_call_operand.hbm [shape: bf16[32,32], index: 7, kind: input, shape index: {}]   ;;  %s2667_s8 = inlined_call_operand.hbm [shape: bf16[32,32], index: 8, kind: input, shape index: {}]   ;;  %s2668_s9 = inlined_call_operand.vmem [shape: f32[1,32], index: 9, kind: input, shape index: {}]   ;;  %s2669_s10 = inlined_call_operand.vmem [shape: f32[1,32], index: 10, kind: input, shape index: {}]   ;;  %s2670_s11 = inlined_call_operand.hbm [shape: f32[32,32], index: 11, kind: output, shape index: {0}]   ;;  %s2671_s12 = inlined_call_operand.hbm [shape: f32[32,96], index: 12, kind: output, shape index: {1}]  }
   0x1   :  { %2677 = sst [smem:[#allocation29_spill]] %s2659_s0 }
   0x2   :  { %2678 = sst [smem:[#allocation30_spill]] %s2661_s2 }
   0x3   :  { %2679 = sst [smem:[#allocation31_spill]] %s2662_s3 }
   0x4   :  { %2680 = sst [smem:[#allocation32_spill]] %s2663_s4 }
   0x5   :  { %2681 = sst [smem:[#allocation33_spill]] %s2664_s5 }
   0x6   :  { %2682 = sst [smem:[#allocation34_spill]] %s2666_s7 }
   0x7   :  { %2683 = sst [smem:[#allocation35_spill]] %s2667_s8 }
   0x8   :  { %18 = vsyncpa [#allocation3], 0 }
   0x9   :  { %20 = vsyncpa [#allocation3 + $0x1], 0 }
   0xa   :  { %21 = vsyncpa [#allocation6], 0 }
   0xb   :  { %23 = vsyncpa [#allocation6 + $0x1], 0 }
   0xc   :  { %24 = vsyncpa [#allocation9], 0 }
   0xd   :  { %25 = vsyncpa [#allocation12], 0 }
   0xe   :  { %26 = vsyncpa [#allocation15], 0 }
   0xf   :  { %27 = vsyncpa [#allocation4], 0 }
  0x10   :  { %29 = vsyncpa [#allocation4 + $0x1], 0 }
  0x11   :  { %30 = vsyncpa [#allocation18], 0 }
  0x12   :  { %32 = vsyncpa [#allocation18 + $0x1], 0  ;;  %s2185_s21 = smov 0   ;;  %s2187_s22 = smov 0  }
  0x13   :  { %s2189_s23 = smov 0   ;;  %s2191_s24 = smov 0  }
  0x14 LB: > { %2684 = sst [smem:[#allocation27_spill]] %s2093_s23  ;;  %s2099_s25 = smov [#allocation7]   ;;  %s2097_s24 = sphi %s2191_s24, %s2718_s24   ;;  %s2093_s23 = sphi %s2189_s23, %s2715_s23   ;;  %s2089_s22 = sphi %s2187_s22, %s2717_s22   ;;  %s2085_s21 = sphi %s2185_s21, %s2716_s21  }
  0x15   : > { %s348_s26 = sshll.u32 %s2099_s25, 4  ;;  %s2206_s27 = sadd.s32 4294967295, %s2097_s24   ;;  %s349_s26 = int_to_ptr.vmem [resolvable:$true] %s348_s26 }
  0x16   : > { %p1445_p0 = scmp.ge.s32.totalorder %s2097_s24, 1  ;;  %p2673_p1 = scmp.eq.s32.totalorder %s2206_s27, 0 }
  0x17   : > { %p336_p2 = scmp.lt.s32.totalorder %s2097_s24, 3  ;;  %s2100_s29 = smov [#allocation8]  }
  0x18   : > { %s361_s30 = sshll.u32 %s2100_s29, 4  ;;  %s2101_s14 = smov [#allocation11]   ;;  %s2224_s30 = int_to_ptr.vmem [resolvable:$true] %s361_s30 }
  0x19   : > { %p2211_p3 = pnand %p1445_p0, %p336_p2  ;;  %s387_s15 = sshll.u32 %s2101_s14, 4  ;;  %s2226_s15 = int_to_ptr.vmem [resolvable:$true] %s387_s15 }
  0x1a   : > { %s1782_s17 = scalar_lea.vmem %s349_s26, 256  ;;  %p1790_p11 = scmp.lt.s32.totalorder %s349_s26, %s349_s26 }
  0x1b   : > { %p1651_p5 = pneg %p2211_p3  ;;  %p1783_p8 = scmp.ne.s32.totalorder %s349_s26, %s1782_s17 }
  0x1c   : > { %p1791_p12 = scmp.lt.s32.totalorder %s1782_s17, %s1782_s17 }
  0x1d   : > { %p2220_p6 = pnand %p1651_p5, %p2673_p1 }
  0x1e   : > { %p1792_p13 = por %p1791_p12, %p1790_p11 }
  0x1f   : > { %p2230_p7 = pneg %p2220_p6 }
  0x21   : > { %p1785_p9 = pnand %p1783_p8, %p2230_p7 }
  0x23   : > { %p1786_p10 = pneg %p1785_p9 }
  0x25   : > { %p1793_p0 = pnand %p1792_p13, %p1786_p10 }
  0x27   : > { %1796 = shalt.err (!%p1793_p0)
}
  0x28   : > { %s2102_s18 = smov 64   ;;  %s2103_s19 = smov 4  }
  0x29   : > { %s2688_s2 = sld [smem:[#allocation30_spill]]  ;;  %s1808_s29 = scalar_lea.vmem %s2224_s30, 256 }
  0x2a   : > { %p1809_p2 = scmp.ne.s32.totalorder %s2224_s30, %s1808_s29  ;;  %p1816_p9 = scmp.lt.s32.totalorder %s2224_s30, %s2224_s30 }
  0x2b   : > { %p1817_p10 = scmp.lt.s32.totalorder %s1808_s29, %s1808_s29 }
  0x2c   : > { %p1811_p5 = pnand %p1809_p2, %p2230_p7 }
  0x2d   : > { %p1818_p11 = por %p1817_p10, %p1816_p9 }
  0x2e   : > { %p1812_p8 = pneg %p1811_p5 }
  0x2f   : > { %1654 = dma.hbm_to_vmem [thread:$0]  (!%p2220_p6), %s2688_s2, 256, %s349_s26, [#allocation6], %s2102_s18, %s2102_s18, %s2103_s19  }
  0x30   : > { %p1819_p12 = pnand %p1818_p11, %p1812_p8 }
  0x32   : > { %1822 = shalt.err (!%p1819_p12)
}
  0x33   : > { %s2689_s3 = sld [smem:[#allocation31_spill]]  ;;  %s1834_s26 = scalar_lea.vmem %s2226_s15, 256 }
  0x34   : > { %p1835_p13 = scmp.ne.s32.totalorder %s2226_s15, %s1834_s26  ;;  %p1842_p5 = scmp.lt.s32.totalorder %s2226_s15, %s2226_s15 }
  0x35   : > { %p1843_p8 = scmp.lt.s32.totalorder %s1834_s26, %s1834_s26 }
  0x36   : > { %p1837_p0 = pnand %p1835_p13, %p2230_p7 }
  0x37   : > { %p1844_p9 = por %p1843_p8, %p1842_p5 }
  0x38   : > { %p1838_p2 = pneg %p1837_p0 }
  0x39   : > { %1657 = dma.hbm_to_vmem [thread:$0]  (!%p2220_p6), %s2689_s3, 256, %s2224_s30, [#allocation9], %s2102_s18, %s2102_s18, %s2103_s19  }
  0x3a   : > { %p1845_p10 = pnand %p1844_p9, %p1838_p2 }
  0x3c   : > { %1848 = shalt.err (!%p1845_p10)
}
  0x3d   : > { %s2690_s5 = sld [smem:[#allocation33_spill]]  ;;  %s2104_s30 = smov [#allocation10]  }
  0x3e   : > { %s374_s29 = sshll.u32 %s2104_s30, 4  ;;  %s2105_s14 = smov [#allocation13]   ;;  %s375_s29 = int_to_ptr.vmem [resolvable:$true] %s374_s29 }
  0x3f   : > { %s403_s17 = sshll.u32 %s2105_s14, 4  ;;  %s1860_s26 = scalar_lea.vmem %s375_s29, 256  ;;  %s404_s17 = int_to_ptr.vmem [resolvable:$true] %s403_s17 }
  0x40   : > { %p1861_p11 = scmp.ne.s32.totalorder %s375_s29, %s1860_s26  ;;  %p1868_p0 = scmp.lt.s32.totalorder %s375_s29, %s375_s29 }
  0x41   : > { %p1869_p2 = scmp.lt.s32.totalorder %s1860_s26, %s1860_s26 }
  0x42   : > { %p1863_p12 = pnand %p1861_p11, %p2230_p7 }
  0x43   : > { %1663 = dma.hbm_to_vmem [thread:$0]  (!%p2220_p6), %s2690_s5, 256, %s2226_s15, [#allocation12], %s2102_s18, %s2102_s18, %s2103_s19  }
  0x44   : > { %p1864_p13 = pneg %p1863_p12  ;;  %p1870_p5 = por %p1869_p2, %p1868_p0 }
  0x46   : > { %p1871_p8 = pnand %p1870_p5, %p1864_p13 }
  0x48   : > { %1874 = shalt.err (!%p1871_p8)
}
  0x49   : > { %s2691_s4 = sld [smem:[#allocation32_spill]]  ;;  %s1886_s25 = scalar_lea.vmem %s404_s17, 256 }
  0x4a   : > { %p1887_p9 = scmp.ne.s32.totalorder %s404_s17, %s1886_s25  ;;  %p1894_p12 = scmp.lt.s32.totalorder %s404_s17, %s404_s17 }
  0x4b   : > { %p1895_p0 = scmp.lt.s32.totalorder %s1886_s25, %s1886_s25 }
  0x4c   : > { %p1889_p10 = pnand %p1887_p9, %p2230_p7 }
  0x4d   : > { %p1896_p13 = por %p1895_p0, %p1894_p12 }
  0x4e   : > { %p1890_p11 = pneg %p1889_p10 }
  0x4f   : > { %1660 = dma.hbm_to_vmem [thread:$0]  (!%p2220_p6), %s2691_s4, 256, %s375_s29, [#allocation9], %s2102_s18, %s2102_s18, %s2103_s19  }
  0x50   : > { %p1897_p2 = pnand %p1896_p13, %p1890_p11 }
  0x52   : > { %1900 = shalt.err (!%p1897_p2)
}
  0x53   : > { %s2692_s7 = sld [smem:[#allocation34_spill]]  ;;  %s2106_s29 = smov [#allocation14]  }
  0x54   : > { %s416_s26 = sshll.u32 %s2106_s29, 4  ;;  %s417_s26 = int_to_ptr.vmem [resolvable:$true] %s416_s26 }
  0x55   : > { %s1912_s15 = scalar_lea.vmem %s417_s26, 256  ;;  %p1920_p10 = scmp.lt.s32.totalorder %s417_s26, %s417_s26 }
  0x56   : > { %p1913_p5 = scmp.ne.s32.totalorder %s417_s26, %s1912_s15  ;;  %p1921_p11 = scmp.lt.s32.totalorder %s1912_s15, %s1912_s15 }
  0x58   : > { %p1915_p8 = pnand %p1913_p5, %p2230_p7  ;;  %p1922_p12 = por %p1921_p11, %p1920_p10 }
  0x59   : > { %1666 = dma.hbm_to_vmem [thread:$0]  (!%p2220_p6), %s2692_s7, 256, %s404_s17, [#allocation12], %s2102_s18, %s2102_s18, %s2103_s19  }
  0x5a   : > { %p1916_p9 = pneg %p1915_p8 }
  0x5c   : > { %p1923_p0 = pnand %p1922_p12, %p1916_p9 }
  0x5e   : > { %1926 = shalt.err (!%p1923_p0)
}
  0x5f   : > { %s2693_s8 = sld [smem:[#allocation35_spill]]  ;;  %s1444_s13 = sadd.s32 4294967294, %s2097_s24  }
  0x60   : > { %s2306_s16 = sadd.s32 1, %s2097_s24   ;;  %s45_s30 = sadd.s32 1, %s2093_s23 }
  0x61   : > { %s42_s25 = ssub.s32 %s2097_s24, %s2306_s16  ;;  %p52_p13 = scmp.ne.s32.totalorder %s2093_s23, %s2089_s22 }
  0x62   : > { %p43_p7 = scmp.eq.s32.totalorder %s42_s25, 0  ;;  %p53_p2 = scmp.eq.s32.totalorder %s2097_s24, 0 }
  0x63   : > { %p58_p5 = scmp.ne.s32.totalorder %s2089_s22, %s2085_s21  ;;  %p297_p9 = scmp.eq.s32.totalorder %s2206_s27, 1 }
  0x64   : > { %s2317_s14 = scalar_select %p43_p7, %s2093_s23, %s45_s30  }
  0x65   : > { %1669 = dma.hbm_to_vmem [thread:$0]  (!%p2220_p6), %s2693_s8, 256, %s417_s26, [#allocation15], %s2102_s18, %s2102_s18, %s2103_s19  }
  0x66   : > { %2694 = sst [smem:[#allocation28_spill]] %s2317_s14  ;;  %p2319_p8 = por %p53_p2, %p52_p13 }
  0x67   : > { %p2325_p6 = por %p2673_p1, %p58_p5  ;;  %p303_p10 = scmp.eq.s32.totalorder %s1444_s13, 1 }
  0x68   : > { %p1690_p11 = scmp.lt.s32.totalorder %s2097_s24, 2  ;;  %s436_s19 = sand.u32 1, %s2093_s23  }
  0x69   : > { %s2696_s18 = scalar_select %p2325_p6, 1, 0 }
  0x6a   : > { %p2332_p12 = por %p297_p9, %p52_p13  ;;  %p2336_p0 = por %p303_p10, %p58_p5 }
  0x6b   : > { %s2340_s20 = sshll.u32 %s436_s19, 4  ;;  %s2672_s17 = sshll.u32 %s2097_s24, 8 }
  0x6c   : > { %s2697_s26 = scalar_select %p2332_p12, 1, 0 }
  0x6d   : > { %s2698_s15 = scalar_select %p2336_p0, 1, 0 }
  0x6e   : > { %s2699_s0 = sld [smem:[#allocation29_spill]]  ;;  %s440_s13 = scalar_lea.vmem [#allocation2], %s2340_s20 }
  0x6f   : > { %s447_s3 = sshll.u32 %s440_s13, 4  ;;  %p2355_p7 = pnand %p1690_p11, %p2319_p8  ;;  %s2351_s3 = int_to_ptr.vmem [resolvable:$true] %s447_s3 }
  0x70   : > { %s2359_s5 = scalar_lea.sflag [#allocation3], %s436_s19 }
  0x71   : > { %p1929_p2 = pneg %p2355_p7 }
  0x74   : > { %s2348_s2 = scalar_lea.hbm %s2699_s0, %s2672_s17  ;;  %s1932_s29 = scalar_lea.hbm %s2699_s0, 512 }
  0x75   : > { %s1927_s7 = scalar_lea.hbm %s2348_s2, 256  ;;  %p1933_p8 = scmp.lt.s32.totalorder %s2348_s2, %s2699_s0 }
  0x76   : > { %p1928_p13 = scmp.ne.s32.totalorder %s2348_s2, %s1927_s7  ;;  %p1934_p10 = scmp.lt.s32.totalorder %s1932_s29, %s1927_s7 }
  0x78   : > { %p1930_p5 = pnand %p1929_p2, %p1928_p13  ;;  %p1935_p11 = por %p1934_p10, %p1933_p8 }
  0x7a   : > { %p1931_p9 = pneg %p1930_p5 }
  0x7c   : > { %p1936_p4 = pnand %p1935_p11, %p1931_p9 }
  0x7e   : > { %1939 = shalt.err (!%p1936_p4)
}
  0x7f   : > { %s1940_s19 = scalar_lea.vmem %s2351_s3, 256  ;;  %s2107_s25 = smov [#allocation2]  }
  0x80   : > { %p1941_p1 = scmp.ne.s32.totalorder %s2351_s3, %s1940_s19  ;;  %s1945_s30 = sshll.u32 %s2107_s25, 4  ;;  %s1946_s30 = int_to_ptr.vmem [resolvable:$false] %s1945_s30 }
  0x81   : > { %s1947_s8 = scalar_lea.vmem %s1946_s30, 512  ;;  %p1948_p0 = scmp.lt.s32.totalorder %s2351_s3, %s1946_s30 }
  0x82   : > { %p1943_p13 = pnand %p1941_p1, %p1929_p2  ;;  %p1949_p12 = scmp.lt.s32.totalorder %s1947_s8, %s1940_s19 }
  0x84   : > { %p1944_p5 = pneg %p1943_p13  ;;  %p1950_p6 = por %p1949_p12, %p1948_p0 }
  0x86   : > { %p1951_p8 = pnand %p1950_p6, %p1944_p5 }
  0x88   : > { %1954 = shalt.err (!%p1951_p8)
}
  0x89   : > { %s2108_s7 = smov 128   ;;  %s2109_s17 = smov 8  }
  0x8a   : > { %1673 = dma.hbm_to_vmem [thread:$0]  (!%p2355_p7), %s2348_s2, 256, %s2351_s3, %s2359_s5, %s2108_s7, %s2108_s7, %s2109_s17  }
  0x8b   : > { %s2701_s29 = sshll.u32 %s2097_s24, 8  ;;  %s461_s25 = scalar_lea.vmem [#allocation5], %s2340_s20 }
  0x8c   : > { %s2394_s19 = scalar_lea.hbm %s2660_s1, %s2701_s29  ;;  %s468_s30 = sshll.u32 %s461_s25, 4  ;;  %s2397_s30 = int_to_ptr.vmem [resolvable:$true] %s468_s30 }
  0x8d   : > { %s457_s0 = sand.u32 1, %s2097_s24   ;;  %s1955_s23 = scalar_lea.hbm %s2394_s19, 256 }
  0x8e   : > { %s458_s14 = scalar_lea.sflag [#allocation6], %s457_s0  ;;  %p1956_p1 = scmp.ne.s32.totalorder %s2394_s19, %s1955_s23 }
  0x8f   : > { %s1960_s5 = scalar_lea.hbm %s2660_s1, 512  ;;  %p1961_p12 = scmp.lt.s32.totalorder %s2394_s19, %s2660_s1 }
  0x90   : > { %p1958_p4 = pnand %p1956_p1, %p1929_p2  ;;  %p1962_p0 = scmp.lt.s32.totalorder %s1960_s5, %s1955_s23 }
  0x92   : > { %p1959_p6 = pneg %p1958_p4  ;;  %p1963_p9 = por %p1962_p0, %p1961_p12 }
  0x94   : > { %p1964_p10 = pnand %p1963_p9, %p1959_p6 }
  0x96   : > { %1967 = shalt.err (!%p1964_p10)
}
  0x97   : > { %s1968_s0 = scalar_lea.vmem %s2397_s30, 256  ;;  %s2110_s20 = smov [#allocation5]  }
  0x98   : > { %p1969_p11 = scmp.ne.s32.totalorder %s2397_s30, %s1968_s0  ;;  %s1973_s13 = sshll.u32 %s2110_s20, 4  ;;  %s1974_s13 = int_to_ptr.vmem [resolvable:$false] %s1973_s13 }
  0x99   : > { %s1975_s25 = scalar_lea.vmem %s1974_s13, 512  ;;  %p1976_p8 = scmp.lt.s32.totalorder %s2397_s30, %s1974_s13 }
  0x9a   : > { %p1971_p13 = pnand %p1969_p11, %p1929_p2  ;;  %p1977_p1 = scmp.lt.s32.totalorder %s1975_s25, %s1968_s0 }
  0x9c   : > { %p1972_p5 = pneg %p1971_p13  ;;  %p1978_p4 = por %p1977_p1, %p1976_p8 }
  0x9e   : > { %p1979_p12 = pnand %p1978_p4, %p1972_p5 }
  0xa0   : > { %1982 = shalt.err (!%p1979_p12)
}
  0xa1   : > { %1676 = dma.hbm_to_vmem [thread:$0]  (!%p2355_p7), %s2394_s19, 256, %s2397_s30, %s458_s14, %s2108_s7, %s2108_s7, %s2109_s17  }
  0xa2   : > { %480 = sbr.rel (%p2211_p3) target bundleno = 1113 (0x459), region = 64  ;;  %s2428_s23 = sand.u32 (!%p2211_p3), 1, %s2089_s22  }
  0xa3   : > { %s2431_s2 = sshll.u32 (!%p2211_p3), %s2428_s23, 4  ;;  %s483_s3 = scalar_lea.sflag (!%p2211_p3), [#allocation3], %s2428_s23 }
  0xa4   : > { %s486_s4 = scalar_lea.vmem (!%p2211_p3), [#allocation2], %s2431_s2  ;;  %p2702_p2 = scmp.ne.s32.totalorder (!%p2211_p3), %s2696_s18, 0 }
  0xa7   : > { %2052 = dma.done.wait (%p2702_p2), %s483_s3, 256  }
  0xa8   : > { %2054 = vsyncadd (%p2702_p2), %s483_s3, 4294967040  ;;  %s491_s28 = sand.u32 1, %s2206_s27   ;;  %s495_s7 = scalar_lea.vmem [#allocation5], %s2431_s2 }
  0xa9   : > { %s492_s14 = scalar_lea.sflag [#allocation6], %s491_s28 }
  0xaa   : > { %2056 = dma.done.wait (%p2702_p2), %s492_s14, 256  }
  0xab   : > { %2058 = vsyncadd (%p2702_p2), %s492_s14, 4294967040  ;;  %p2703_p3 = scmp.eq.s32.totalorder %s2206_s27, 0 }
  0xad   : > { %2060 = dma.done.wait (%p2703_p3), [#allocation6], 256   ;;  %p2704_p7 = pmov %p2703_p3 }
  0xae   : > { %p2705_p6 = pmov %p2703_p3 }
  0xaf   : > { %2062 = vsyncadd (%p2704_p7), [#allocation6], 4294967040 }
  0xb0   : > { %2064 = dma.done.wait (%p2705_p6), [#allocation9], 512   ;;  %p2706_p0 = pmov %p2703_p3 }
  0xb2   : > { %2066 = vsyncadd (%p2706_p0), [#allocation9], 4294966784  ;;  %p2707_p9 = pmov %p2706_p0 }
  0xb3   : > { %p2708_p10 = pmov %p2706_p0 }
  0xb4   : > { %2068 = dma.done.wait (%p2707_p9), [#allocation12], 512  }
  0xb5   : > { %2070 = vsyncadd (%p2708_p10), [#allocation12], 4294966784  ;;  %p2709_p11 = pmov %p2706_p0 }
  0xb6   : > { %p2710_p13 = pmov %p2706_p0 }
  0xb7   : > { %2072 = dma.done.wait (%p2709_p11), [#allocation15], 256  }
  0xb8   : > { %2074 = vsyncadd (%p2710_p13), [#allocation15], 4294967040  ;;  %v2111_v0 = vmov 0.0   ;;  %vm2112_vm0 = vmmov 0   ;;  %v575_v1 = vld [vmem:[%s495_s7] sm:$0xff]  ;;  %v576_v2 = vld [vmem:[%s495_s7 + $0x8] sm:$0xff] }
  0xb9   : > { %1539 = vmatprep.subr.bf16.mxu0 %v2111_v0  ;;  %1547 = vmatprep.subr.bf16.mxu1 %v2111_v0  ;;  %v585_v3 = vpack.c.bf16 %v576_v2, %v575_v1  ;;  %v1747_v4 = vld [vmem:[#allocation7 + $0x8] sm:$0xff]   ;;  %v1748_v5 = vld [vmem:[#allocation8 + $0x8] sm:$0xff]   ;;  %s2113_s18 = smov 96   ;;  %v1749_v6 = vld [vmem:[#allocation7] sm:$0xff]   ;;  %vm598_vm1 = vcmask 261120   ;;  %s2114_s17 = smov 64  }
  0xba   : > { %1543 = vmatprep.mubr.msk.bf16.mxu0 %vm2112_vm0, %v2111_v0  ;;  %1551 = vmatprep.mubr.msk.bf16.mxu1 %vm2112_vm0, %v2111_v0  ;;  %v1750_v7 = vld [vmem:[#allocation8] sm:$0xff]   ;;  %v1751_v10 = vld [vmem:[#allocation10 + $0x8] sm:$0xff]   ;;  %v1753_v11 = vld [vmem:[#allocation11 + $0x8] sm:$0xff]   ;;  %s2115_s20 = smov 32   ;;  %s2554_s13 = scalar_lea.vmem [#allocation17], %s2431_s2 }
  0xbb   : > { %697 = vrot.lane.b32.xlu0 %v585_v3, %s2113_s18  ;;  %1540 = vmatpush3.bf16.msra.mxu0 %v1747_v4  ;;  %v1752_v13 = vld [vmem:[#allocation10] sm:$0xff]   ;;  %v910_v16 = vld [vmem:[%s486_s4 + $0x8] sm:$0xff]  ;;  %v1754_v17 = vld [vmem:[#allocation11] sm:$0xff]   ;;  %s1507_s25 = sshll.u32 %s2206_s27, 8  ;;  %s562_s3 = scalar_lea.vmem [#allocation16], %s2431_s2 }
  0xbc   : > { %1548 = vmatpush3.bf16.msra.mxu1 %v1748_v5  ;;  %1541 = vmatprep.subr.bf16.mxu0 %v2111_v0  ;;  %v909_v15 = vld [vmem:[%s486_s4] sm:$0xff]  ;;  %s1243_s4 = sshll.u32 %s562_s3, 4  ;;  %s2568_s7 = scalar_lea.hbm %s2670_s11, %s1507_s25  ;;  %s2570_s4 = int_to_ptr.vmem [resolvable:$true] %s1243_s4 }
  0xbd   : > { %1549 = vmatprep.subr.bf16.mxu1 %v2111_v0  ;;  %v911_v21 = vpack.c.bf16 %v910_v16, %v909_v15  ;;  %v1755_v16 = vld [vmem:[#allocation14 + $0x8] sm:$0xff]   ;;  %s1225_s2 = scalar_lea.sflag [#allocation4], %s2428_s23  ;;  %s1983_s18 = scalar_lea.vmem %s2570_s4, 256 }
  0xbe   : > { %p1984_p5 = scmp.ne.s32.totalorder %s2570_s4, %s1983_s18  ;;  %p2711_p8 = scmp.ne.s32.totalorder %s2697_s26, 0 }
  0xbf   : > { %784 = vrot.lane.b32.xlu0 %v585_v3, %s2114_s17  ;;  %1542 = vmatpush3.bf16.msra.mxu0 %v1749_v6  ;;  %s2116_s19 = smov [#allocation16]  }
  0xc0   : > { %1550 = vmatpush3.bf16.msra.mxu1 %v1750_v7  ;;  %1555 = vmatprep.subr.bf16.mxu0 %v2111_v0  ;;  %p1985_p1 = pnand %p1984_p5, %p2711_p8  ;;  %s1987_s30 = sshll.u32 %s2116_s19, 4  ;;  %s1988_s30 = int_to_ptr.vmem [resolvable:$false] %s1987_s30 }
  0xc1   : > { %1563 = vmatprep.subr.bf16.mxu1 %v2111_v0  ;;  %s1989_s5 = scalar_lea.vmem %s1988_s30, 512  ;;  %p1990_p12 = scmp.lt.s32.totalorder %s2570_s4, %s1988_s30 }
  0xc2   : > { %1544 = vmatmul.mubr.msk.bf16.vlgmr.msra.gmra.mxu0 %vm598_vm1, %v585_v3  ;;  %p1986_p4 = pneg %p1985_p1  ;;  %p1991_p2 = scmp.lt.s32.totalorder %s1989_s5, %s1983_s18 }
  0xc3   : > { %1552 = vmatmul.mubr.msk.bf16.vlgmr.msra.gmra.mxu1 %vm598_vm1, %v585_v3  ;;  %1556 = vmatpush3.bf16.msra.mxu0 %v1747_v4 }
  0xc4   : > { %1564 = vmatpush3.bf16.msra.mxu1 %v1748_v5  ;;  %1557 = vmatprep.subr.bf16.mxu0 %v2111_v0  ;;  %p1992_p3 = por %p1991_p2, %p1990_p12 }
  0xc5   : > { %1565 = vmatprep.subr.bf16.mxu1 %v2111_v0  ;;  %1559 = vmatprep.mubr.msk.bf16.mxu0 %vm2112_vm0, %v2111_v0 }
  0xc6   : > { %1567 = vmatprep.mubr.msk.bf16.mxu1 %vm2112_vm0, %v2111_v0  ;;  %p1993_p7 = pnand %p1992_p3, %p1986_p4 }
  0xc7   : > { %1558 = vmatpush3.bf16.msra.mxu0 %v1749_v6 }
  0xc8   : > { %1566 = vmatpush3.bf16.msra.mxu1 %v1750_v7  ;;  %1571 = vmatprep.subr.bf16.mxu0 %v2111_v0 }
  0xc9   : > { %1579 = vmatprep.subr.bf16.mxu1 %v2111_v0 }
 0x12d   : > { %v698_v8 = vpop.permute.xlu0 %697 }
 0x12e   : > { %1560 = vmatmul.mubr.msk.bf16.vlgmr.msra.gmra.mxu0 %vm598_vm1, %v698_v8  ;;  %1568 = vmatmul.mubr.msk.bf16.vlgmr.msra.gmra.mxu1 %vm598_vm1, %v698_v8 }
 0x12f   : > { %1572 = vmatpush3.bf16.msra.mxu0 %v1747_v4  ;;  %1580 = vmatpush3.bf16.msra.mxu1 %v1748_v5 }
 0x130   : > { %1573 = vmatprep.subr.bf16.mxu0 %v2111_v0  ;;  %1581 = vmatprep.subr.bf16.mxu1 %v2111_v0 }
 0x131   : > { %1575 = vmatprep.mubr.msk.bf16.mxu0 %vm2112_vm0, %v2111_v0  ;;  %1583 = vmatprep.mubr.msk.bf16.mxu1 %vm2112_vm0, %v2111_v0  ;;  %v785_v9 = vpop.permute.xlu0 %784 }
 0x133   : > { %1574 = vmatpush3.bf16.msra.mxu0 %v1749_v6  ;;  %1582 = vmatpush3.bf16.msra.mxu1 %v1750_v7 }
 0x134   : > { %1595 = vmatprep.subr.bf16.mxu1 %v2111_v0  ;;  %1587 = vmatprep.subr.bf16.mxu0 %v2111_v0 }
 0x136   : > { %1576 = vmatmul.mubr.msk.bf16.vlgmr.msra.gmra.mxu0 %vm598_vm1, %v785_v9  ;;  %1584 = vmatmul.mubr.msk.bf16.vlgmr.msra.gmra.mxu1 %vm598_vm1, %v785_v9 }
 0x137   : > { %1599 = vmatprep.mubr.msk.bf16.mxu1 %vm2112_vm0, %v2111_v0  ;;  %1591 = vmatprep.mubr.msk.bf16.mxu0 %vm2112_vm0, %v2111_v0 }
 0x138   : > { %1596 = vmatpush3.bf16.msra.mxu1 %v1751_v10  ;;  %1588 = vmatpush3.bf16.msra.mxu0 %v1753_v11 }
 0x139   : > { %1597 = vmatprep.subr.bf16.mxu1 %v2111_v0  ;;  %1589 = vmatprep.subr.bf16.mxu0 %v2111_v0 }
 0x13c   : > { %1598 = vmatpush3.bf16.msra.mxu1 %v1752_v13  ;;  %1590 = vmatpush3.bf16.msra.mxu0 %v1754_v17  ;;  %v1756_v17 = vld [vmem:[#allocation13 + $0x8] sm:$0xff]  }
 0x13d   : > { %1611 = vmatprep.subr.bf16.mxu1 %v2111_v0  ;;  %1603 = vmatprep.subr.bf16.mxu0 %v2111_v0 }
 0x13f   : > { %1600 = vmatmul.mubr.msk.bf16.vlgmr.msra.gmra.mxu1 %vm598_vm1, %v911_v21  ;;  %v1486_v21 = vld [vmem:[%s2665_s6] ss:$0 sm:$0xff] }
 0x140   : > { %1615 = vmatprep.mubr.msk.bf16.mxu1 %vm2112_vm0, %v2111_v0  ;;  %1612 = vmatpush3.bf16.msra.mxu1 %v1755_v16 }
 0x141   : > { %1613 = vmatprep.subr.bf16.mxu1 %v2111_v0 }
 0x182   : > { %v636_v12 = vpop.f32.mrf.mxu0 }
 0x183   : > { %v2498_v14 = vpop.f32.mrf.mxu1  ;;  %v871_v39 = vmul.f32 %v636_v12, %v636_v12 }
 0x184   : > { %v1545_v18 = vpop.f32.mrf.mxu0  ;;  %v881_v27 = vmul.f32 %v2498_v14, %v636_v12 }
 0x185   : > { %v1553_v19 = vpop.f32.mrf.mxu1  ;;  %v1757_v18 = vld [vmem:[#allocation14] sm:$0xff]  }
 0x186   : > { %v639_v20 = vpop.f32.mrf.mxu0  ;;  %v1758_v19 = vld [vmem:[#allocation13] sm:$0xff]   ;;  %1614 = vmatpush3.bf16.msra.mxu1 %v1757_v18 }
 0x187   : > { %v2506_v22 = vpop.f32.mrf.mxu1  ;;  %v872_v49 = vmul.f32 %v639_v20, %v639_v20 }
 0x188   : > { %v1546_v23 = vpop.f32.mrf.mxu0  ;;  %v882_v34 = vmul.f32 %v2506_v22, %v639_v20 }
 0x189   : > { %v1554_v24 = vpop.f32.mrf.mxu1 }
 0x1ee   : > { %v736_v25 = vpop.f32.mrf.mxu0  ;;  %v2513_v26 = vpop.f32.mrf.mxu1 }
 0x1ef   : > { %v883_v28 = vmul.f32 %v2513_v26, %v736_v25  ;;  %v873_v35 = vmul.f32 %v736_v25, %v736_v25 }
 0x1f0   : > { %v1561_v29 = vpop.f32.mrf.mxu0  ;;  %v1569_v30 = vpop.f32.mrf.mxu1 }
 0x1f1   : > { %v885_v31 = vadd.f32 %v883_v28, %v881_v27  ;;  %v875_v43 = vadd.f32 %v873_v35, %v871_v39 }
 0x1f2   : > { %v739_v32 = vpop.f32.mrf.mxu0  ;;  %v2517_v33 = vpop.f32.mrf.mxu1 }
 0x1f3   : > { %v884_v36 = vmul.f32 %v2517_v33, %v739_v32  ;;  %v874_v44 = vmul.f32 %v739_v32, %v739_v32 }
 0x1f4   : > { %v1562_v37 = vpop.f32.mrf.mxu0  ;;  %v1570_v38 = vpop.f32.mrf.mxu1 }
 0x1f5   : > { %v886_v40 = vadd.f32 %v884_v36, %v882_v34  ;;  %v876_v54 = vadd.f32 %v874_v44, %v872_v49  ;;  %v1493_v44 = vld [vmem:[%s2669_s10] ss:$0 sm:$0xff] }
 0x1f6   : > { %v823_v41 = vpop.f32.mrf.mxu0  ;;  %v2521_v42 = vpop.f32.mrf.mxu1 }
 0x1f7   : > { %v877_v45 = vmul.f32 %v823_v41, %v823_v41  ;;  %v887_v46 = vmul.f32 %v2521_v42, %v823_v41 }
 0x1f8   : > { %v1577_v47 = vpop.f32.mrf.mxu0  ;;  %v1585_v48 = vpop.f32.mrf.mxu1 }
 0x1f9   : > { %v879_v50 = vadd.f32 %v877_v45, %v875_v43  ;;  %v2524_v51 = vadd.f32 %v887_v46, %v885_v31  ;;  %v1489_v43 = vld [vmem:[%s2668_s9] ss:$0 sm:$0xff] }
 0x1fa   : > { %v826_v52 = vpop.f32.mrf.mxu0  ;;  %v2526_v53 = vpop.f32.mrf.mxu1 }
 0x1fb   : > { %v891_v55 = vadd.f32 1e-10, %v879_v50  ;;  %v878_v56 = vmul.f32 %v826_v52, %v826_v52  ;;  %v888_v57 = vmul.f32 %v2526_v53, %v826_v52  ;;  %v907_v47 = vmul.f32 0.17677669, %v2524_v51 }
 0x1fc   : > { %v1578_v58 = vpop.f32.mrf.mxu0  ;;  %v1586_v59 = vpop.f32.mrf.mxu1 }
 0x1fd   : > { %1759 = vrsqrt.f32 %v891_v55  ;;  %v880_v60 = vadd.f32 %v878_v56, %v876_v54  ;;  %v2529_v61 = vadd.f32 %v888_v57, %v886_v40  ;;  %vm895_vm2 = vcmp.eq.f32.partialorder %v891_v55, inf }
 0x1fe   : > { %v898_v5 = vand.u32 2147483648, %v891_v55  ;;  %vm897_vm4 = vcmp.eq.f32.partialorder %v891_v55, 0.0 }
 0x1ff   : > { %v892_v62 = vadd.f32 1e-10, %v880_v60  ;;  %v1026_v11 = vpop.f32.mrf.mxu1  ;;  %v908_v60 = vmul.f32 0.17677669, %v2529_v61 }
 0x201   : > { %1761 = vrsqrt.f32 %v892_v62  ;;  %vm902_vm3 = vcmp.eq.f32.partialorder %v892_v62, inf  ;;  %v905_v6 = vand.u32 2147483648, %v892_v62  ;;  %vm904_vm5 = vcmp.eq.f32.partialorder %v892_v62, 0.0  ;;  %v1601_v12 = vpop.f32.mrf.mxu1 }
 0x203   : > { %v1029_v13 = vpop.f32.mrf.mxu1 }
 0x205   : > { %v1602_v15 = vpop.f32.mrf.mxu1 }
 0x20a   : > { %v1760_v63 = vpop.eup %1759 }
 0x20b   : > { %v894_v1 = vmul.f32 %v1760_v63, %v891_v55 }
 0x20d   : > { %v896_v3 = vsel %vm895_vm2, %v891_v55, %v894_v1 }
 0x20e   : > { %v1762_v2 = vpop.eup %1761  ;;  %v899_v8 = vsel %vm897_vm4, %v898_v5, %v896_v3 }
 0x20f   : > { %v901_v4 = vmul.f32 %v1762_v2, %v892_v62 }
 0x211   : > { %v903_v7 = vsel %vm902_vm3, %v892_v62, %v901_v4 }
 0x212   : > { %v906_v9 = vsel %vm904_vm5, %v905_v6, %v903_v7 }
 0x213   : > { %v916_v10 = vpack.c.bf16 %v906_v9, %v899_v8 }
 0x215   : > { %1592 = vmatmul.mubr.msk.bf16.vlgmr.msra.gmra.mxu0 %vm598_vm1, %v916_v10 }
 0x216   : > { %1607 = vmatprep.mubr.msk.bf16.mxu0 %vm2112_vm0, %v2111_v0  ;;  %1604 = vmatpush3.bf16.msra.mxu0 %v1756_v17 }
 0x217   : > { %1605 = vmatprep.subr.bf16.mxu0 %v2111_v0 }
 0x21a   : > { %1606 = vmatpush3.bf16.msra.mxu0 %v1758_v19 }
 0x2d5   : > { %v970_v20 = vpop.f32.mrf.mxu0 }
 0x2d6   : > { %v1027_v23 = vadd.f32 %v1026_v11, %v970_v20 }
 0x2d7   : > { %v1593_v24 = vpop.f32.mrf.mxu0 }
 0x2d8   : > { %v1040_v25 = vadd.f32 %v1486_v21, %v1027_v23 }
 0x2d9   : > { %v973_v27 = vpop.f32.mrf.mxu0 }
 0x2da   : > { %v1487_v28 = vmul.f32 -1.442695, %v1040_v25  ;;  %v1030_v29 = vadd.f32 %v1029_v13, %v973_v27 }
 0x2db   : > { %v1594_v30 = vpop.f32.mrf.mxu0 }
 0x2dc   : > { %1763 = vpow2.f32 %v1487_v28  ;;  %v1041_v31 = vadd.f32 %v1486_v21, %v1030_v29 }
 0x2de   : > { %v1488_v32 = vmul.f32 -1.442695, %v1041_v31 }
 0x2e0   : > { %1765 = vpow2.f32 %v1488_v32 }
 0x2e9   : > { %v1764_v0 = vpop.eup %1763 }
 0x2ea   : > { %v1048_v34 = vadd.f32 1.0, %v1764_v0 }
 0x2ec   : > { %1767 = vrcp.f32 %v1048_v34 }
 0x2ed   : > { %v1766_v35 = vpop.eup %1765 }
 0x2ee   : > { %v1049_v36 = vadd.f32 1.0, %v1766_v35 }
 0x2f0   : > { %1769 = vrcp.f32 %v1049_v36 }
 0x2f9   : > { %v1768_v37 = vpop.eup %1767 }
 0x2fa   : > { %v1054_v39 = vmul.f32 %v1768_v37, %v1040_v25 }
 0x2fd   : > { %v1770_v38 = vpop.eup %1769 }
 0x2fe   : > { %v1055_v40 = vmul.f32 %v1770_v38, %v1041_v31 }
 0x300   : > { %v1056_v41 = vpack.c.bf16 %v1055_v40, %v1054_v39 }
 0x302   : > { %1608 = vmatmul.mubr.msk.bf16.vlgmr.msra.gmra.mxu0 %vm598_vm1, %v1056_v41  ;;  %1616 = vmatmul.mubr.msk.bf16.vlgmr.msra.gmra.mxu1 %vm598_vm1, %v1056_v41 }
 0x3c2   : > { %v1117_v45 = vpop.f32.mrf.mxu0  ;;  %v1181_v46 = vpop.f32.mrf.mxu1 }
 0x3c3   : > { %v1118_v48 = vadd.f32 %v1489_v43, %v1117_v45  ;;  %v1182_v49 = vadd.f32 %v1493_v44, %v1181_v46 }
 0x3c4   : > { %v1609_v50 = vpop.f32.mrf.mxu0  ;;  %v1617_v52 = vpop.f32.mrf.mxu1 }
 0x3c5   : > { %v1188_v54 = vadd.f32 %v1118_v48, %v907_v47  ;;  %v1194_v55 = vmul.f32 %v1182_v49, %v2498_v14  ;;  %v1211_v56 = vmul.f32 %v1182_v49, %v2521_v42  ;;  %v1198_v57 = vmul.f32 %v1182_v49, %v2513_v26 }
 0x3c6   : > { %v1120_v58 = vpop.f32.mrf.mxu0  ;;  %v1184_v59 = vpop.f32.mrf.mxu1 }
 0x3c7   : > { %v1190_v62 = vmul.f32 0.70710677, %v1188_v54  ;;  %v1121_v51 = vadd.f32 %v1489_v43, %v1120_v58  ;;  %v1185_v63 = vadd.f32 %v1493_v44, %v1184_v59  ;;  %1215 = vrot.lane.b32.xlu0 %v1211_v56, %s2114_s17  ;;  %1202 = vrot.lane.b32.xlu1 %v1198_v57, %s2115_s20  ;;  %1196 = vst.msk [vmem:[%s2554_s13] sm:$0xff] %vm598_vm1, %v1194_v55 }
 0x3c8   : > { %v1610_v14 = vpop.f32.mrf.mxu0  ;;  %v1618_v26 = vpop.f32.mrf.mxu1 }
 0x3c9   : > { %1192 = vst.msk [vmem:[%s562_s3] sm:$0xff] %vm598_vm1, %v1190_v62  ;;  %v1189_v42 = vadd.f32 %v1121_v51, %v908_v60  ;;  %v1195_v61 = vmul.f32 %v1185_v63, %v2506_v22  ;;  %v1199_v1 = vmul.f32 %v1185_v63, %v2517_v33  ;;  %v1212_v22 = vmul.f32 %v1185_v63, %v2526_v53 }
 0x3cb   : > { %v1191_v2 = vmul.f32 0.70710677, %v1189_v42  ;;  %1204 = vrot.lane.b32.xlu1 %v1199_v1, %s2115_s20  ;;  %1197 = vst.msk [vmem:[%s2554_s13 + $0x8] sm:$0xff] %vm598_vm1, %v1195_v61 }
 0x3cd   : > { %1193 = vst.msk [vmem:[%s562_s3 + $0x8] sm:$0xff] %vm598_vm1, %v1191_v2 }
 0x3ce   : > { %1996 = shalt.err (!%p1993_p7)
}
 0x3cf   : > { %s1997_s29 = scalar_lea.hbm %s2568_s7, 256  ;;  %s2001_s20 = scalar_lea.hbm %s2670_s11, 512 }
 0x3d0   : > { %p1998_p6 = scmp.ne.s32.totalorder %s2568_s7, %s1997_s29  ;;  %p2002_p10 = scmp.lt.s32.totalorder %s2568_s7, %s2670_s11 }
 0x3d1   : > { %p2003_p11 = scmp.lt.s32.totalorder %s2001_s20, %s1997_s29 }
 0x3d2   : > { %p1999_p0 = pnand %p1998_p6, %p2711_p8 }
 0x3d3   : > { %p2004_p13 = por %p2003_p11, %p2002_p10 }
 0x3d4   : > { %p2000_p9 = pneg %p1999_p0 }
 0x3d6   : > { %p2005_p5 = pnand %p2004_p13, %p2000_p9 }
 0x3d8   : > { %2008 = shalt.err (!%p2005_p5)
}
 0x3d9   : > { %s2117_s14 = smov 128   ;;  %s2118_s18 = smov 8   ;;  %1217 = vrot.lane.b32.xlu1 %v1212_v22, %s2114_s17  ;;  %vm1208_vm6 = vcmask 523520   ;;  %vm1221_vm7 = vcmask 785920  }
 0x3da   : > { %1647 = dma.vmem_to_hbm [thread:$0]  (%p2711_p8), %s2570_s4, 256, %s2568_s7, %s1225_s2, %s2117_s14, %s2117_s14, %s2118_s18  }
 0x3db   : > { %s1259_s19 = sshll.u32 %s2554_s13, 4  ;;  %s2612_s29 = scalar_lea.hbm %s2671_s12, %s1507_s25  ;;  %s2614_s19 = int_to_ptr.vmem [resolvable:$true] %s1259_s19 }
 0x3dc   : > { %s1230_s17 = scalar_lea.sflag [#allocation18], %s2428_s23  ;;  %s2009_s4 = scalar_lea.vmem %s2614_s19, 256 }
 0x3dd   : > { %p2010_p1 = scmp.ne.s32.totalorder %s2614_s19, %s2009_s4  ;;  %s2119_s7 = smov [#allocation17]  }
 0x3de   : > { %s2013_s27 = sshll.u32 %s2119_s7, 4  ;;  %s2014_s27 = int_to_ptr.vmem [resolvable:$false] %s2013_s27 }
 0x3df   : > { %p2011_p4 = pnand %p2010_p1, %p2711_p8  ;;  %s2015_s2 = scalar_lea.vmem %s2014_s27, 512 }
 0x3e0   : > { %p2016_p2 = scmp.lt.s32.totalorder %s2614_s19, %s2014_s27  ;;  %p2017_p3 = scmp.lt.s32.totalorder %s2015_s2, %s2009_s4 }
 0x3e1   : > { %p2012_p12 = pneg %p2011_p4 }
 0x3e2   : > { %p2018_p7 = por %p2017_p3, %p2016_p2 }
 0x3e4   : > { %p2019_p6 = pnand %p2018_p7, %p2012_p12 }
 0x439   : > { %v1216_v33 = vpop.permute.xlu0 %1215  ;;  %v1203_v53 = vpop.permute.xlu1 %1202 }
 0x43a   : > { %1209 = vst.msk [vmem:[%s2554_s13] sm:$0xff] %vm1208_vm6, %v1203_v53 }
 0x43b   : > { %1222 = vst.msk [vmem:[%s2554_s13] sm:$0xff] %vm1221_vm7, %v1216_v33 }
 0x43d   : > { %v1205_v3 = vpop.permute.xlu1 %1204 }
 0x43e   : > { %1210 = vst.msk [vmem:[%s2554_s13 + $0x8] sm:$0xff] %vm1208_vm6, %v1205_v3 }
 0x44b   : > { %v1218_v4 = vpop.permute.xlu1 %1217 }
 0x44c   : > { %1223 = vst.msk [vmem:[%s2554_s13 + $0x8] sm:$0xff] %vm1221_vm7, %v1218_v4 }
 0x44d   : > { %2022 = shalt.err (!%p2019_p6)
}
 0x44e   : > { %s2023_s13 = scalar_lea.hbm %s2612_s29, 256  ;;  %s2027_s8 = scalar_lea.hbm %s2671_s12, 512 }
 0x44f   : > { %p2024_p0 = scmp.ne.s32.totalorder %s2612_s29, %s2023_s13  ;;  %p2028_p11 = scmp.lt.s32.totalorder %s2612_s29, %s2671_s12 }
 0x450   : > { %p2029_p13 = scmp.lt.s32.totalorder %s2027_s8, %s2023_s13 }
 0x451   : > { %p2025_p9 = pnand %p2024_p0, %p2711_p8 }
 0x452   : > { %p2030_p5 = por %p2029_p13, %p2028_p11 }
 0x453   : > { %p2026_p10 = pneg %p2025_p9 }
 0x455   : > { %p2031_p1 = pnand %p2030_p5, %p2026_p10 }
 0x457   : > { %2034 = shalt.err (!%p2031_p1)
}
 0x458   : > { %1648 = dma.vmem_to_hbm [thread:$0]  (%p2711_p8), %s2614_s19, 256, %s2612_s29, %s1230_s17, %s2117_s14, %s2117_s14, %s2118_s18  }
 0x459 PF: > { %s1274_s3 = sand.u32 1, %s2085_s21   ;;  %p2712_p4 = scmp.ne.s32.totalorder %s2698_s15, 0 }
 0x45a   : > { %p2713_p12 = scmp.ge.s32.totalorder %s2097_s24, 2  ;;  %s1275_s28 = scalar_lea.sflag [#allocation4], %s1274_s3 }
 0x45c   : > { %p1678_p2 = pnand %p2713_p12, %p2712_p4 }
 0x45e   : > { %p1679_p3 = pneg %p1678_p2 }
 0x460   : > { %2076 = dma.done.wait (%p1679_p3), %s1275_s28, 256  }
 0x461   : > { %2078 = vsyncadd (%p1679_p3), %s1275_s28, 4294967040  ;;  %s1284_s30 = scalar_lea.sflag [#allocation18], %s1274_s3 }
 0x462   : > { %2080 = dma.done.wait (%p1679_p3), %s1284_s30, 256  }
 0x463   : > { %2082 = vsyncadd (%p1679_p3), %s1284_s30, 4294967040  ;;  %s2714_s26 = sld [smem:[#allocation27_spill]]  ;;  %p35_p8 = scmp.ge.s32.totalorder %s2306_s16, 4  }
 0x464   : > { %s2715_s23 = sld [smem:[#allocation28_spill]]  ;;  %s2716_s21 = smov %s2089_s22 }
 0x465   : > { %s2718_s24 = smov %s2306_s16  ;;  %37 = sbr.rel (!%p35_p8) target bundleno = 20 (0x14), region = 163 }
 0x469   : > { %s2717_s22 = smov %s2714_s26 }
 0x46a   :  { %1289 = vsyncpa [#allocation3], 1 }
 0x46b   :  { %1291 = vsyncpa [#allocation3 + $0x1], 1 }
 0x46c   :  { %1292 = vsyncpa [#allocation6], 1 }
 0x46d   :  { %1294 = vsyncpa [#allocation6 + $0x1], 1 }
 0x46e   :  { %1295 = vsyncpa [#allocation9], 1 }
 0x46f   :  { %1296 = vsyncpa [#allocation12], 1 }
 0x470   :  { %1297 = vsyncpa [#allocation15], 1 }
 0x471   :  { %1298 = vsyncpa [#allocation4], 1 }
 0x472   :  { %1300 = vsyncpa [#allocation4 + $0x1], 1 }
 0x473   :  { %1301 = vsyncpa [#allocation18], 1 }
 0x474   :  { %1303 = vsyncpa [#allocation18 + $0x1], 1 }

</bundles_post_ra>
